<compile_context>
chip_gen: v5e
topology: v5e:2x2
jax: 0.10.0
libtpu: 0.0.40
codegen_flags: <defaults>
</compile_context>

<pallas_src>
import numpy as np
import jax
import jax.numpy as jnp
from jax.experimental import pallas as pl
from jax.experimental.pallas import tpu as pltpu


# ----------------------------------------------------------------------------
# Deterministic parameter setup: replicate scipy.ndimage.gaussian_filter1d
# (default truncate=4.0, mode='reflect') applied to an identity matrix.
# ----------------------------------------------------------------------------
def make_gaussian_vector(num_labels: int, sigma: float) -> np.ndarray:
    radius = int(4.0 * sigma + 0.5)
    t = np.arange(-radius, radius + 1, dtype=np.float64)
    phi = np.exp(-0.5 * (t / sigma) ** 2)
    phi /= phi.sum()
    eye = np.eye(num_labels, dtype=np.float64)
    # scipy 'reflect' boundary == numpy pad mode 'symmetric'
    padded = np.pad(eye, ((0, 0), (radius, radius)), mode="symmetric")
    out = np.empty_like(eye)
    for r in range(num_labels):
        out[r] = np.convolve(padded[r], phi, mode="valid")
    return out.astype(np.float32)


def _round_up(x: int, m: int) -> int:
    return ((x + m - 1) // m) * m


def _choose_tile(batch: int, num_labels: int) -> int:
    """Batch-tile rows: multiple of 8, >=2 grid steps for B>16, VMEM-safe."""
    if batch <= 16:
        return _round_up(max(batch, 8), 8)
    # Aim for at least two grid steps (v7x megacore), cap at 2048 rows.
    tb = min(2048, _round_up((batch + 1) // 2, 8))
    # Keep the x tile <= ~2 MiB so double-buffered inputs + f32 temporaries fit
    # comfortably even under v5e's 16 MiB default scoped VMEM.
    vmem_cap_rows = max(8, ((2 * 1024 * 1024) // (4 * num_labels)) // 8 * 8)
    return max(8, min(tb, vmem_cap_rows))


# ----------------------------------------------------------------------------
# Kernel factory.  One grid step handles a (TB, L) tile of the batch.
#   x_ref   : (TB, L) f32   input rows (last tile may read don't-care rows)
#   g_ref   : (L, L)  f32   full GaussianVector, VMEM-resident
#   tgt_ref : (TB, 1) i32   target labels for this tile
#   out_ref : mean -> (1, L) per-tile column partial sums (lane-dense)
#             none -> (1, TB) per-sample squared-error sums (lane-dense)
# ----------------------------------------------------------------------------
def _make_kernel(*, num_labels: int, tile_b: int, batch: int, mean: bool):
    need_mask = mean and (batch % tile_b != 0)

    def kernel(x_ref, g_ref, tgt_ref, out_ref):
        x = x_ref[...]                                        # (TB, L)
        g = g_ref[...]                                        # (L, L)
        tgt = tgt_ref[...]                                    # (TB, 1) i32

        # Gather G[target, :] via one-hot matmul on the MXU (overlaps VPU work).
        lane = jax.lax.broadcasted_iota(jnp.int32, (tile_b, num_labels), 1)
        onehot = (lane == tgt).astype(jnp.float32)            # (TB, L)
        gathered = jnp.dot(
            onehot, g,
            preferred_element_type=jnp.float32,
            precision=jax.lax.Precision.HIGHEST,              # exact f32 gather
        )

        d = x - gathered
        dsq = d * d                                           # (TB, L)

        if mean:
            if need_mask:
                row = (jax.lax.broadcasted_iota(jnp.int32, (tile_b, 1), 0)
                       + pl.program_id(0) * tile_b)
                dsq = jnp.where(row < batch, dsq, 0.0)        # drop ragged rows
            # Lane-dense per-tile column partial sums; wrapper finishes the mean.
            out_ref[...] = jnp.sum(dsq, axis=0, keepdims=True)   # (1, L)
        else:
            # Per-sample sums; ragged lanes beyond B are masked by Pallas on store.
            out_ref[...] = jnp.sum(dsq, axis=-1)[None, :]        # (1, TB)

    return kernel


def heatmap1d_loss(x, gaussian_vector, target, reduction="mean"):
    B, L = x.shape
    assert gaussian_vector.shape == (L, L)
    assert target.shape == (B,)

    x = x.astype(jnp.float32)
    gaussian_vector = gaussian_vector.astype(jnp.float32)
    tgt2d = target.astype(jnp.int32).reshape(B, 1)

    tb = _choose_tile(B, L)
    num_tiles = pl.cdiv(B, tb)
    mean = (reduction == "mean")

    kernel = _make_kernel(num_labels=L, tile_b=tb, batch=B, mean=mean)

    if mean:
        out_shape = jax.ShapeDtypeStruct((num_tiles, L), jnp.float32)
        out_spec = pl.BlockSpec((1, L), lambda i: (i, 0))
    else:
        out_shape = jax.ShapeDtypeStruct((1, B), jnp.float32)
        out_spec = pl.BlockSpec((1, tb), lambda i: (0, i))

    out = pl.pallas_call(
        kernel,
        out_shape=out_shape,
        grid_spec=pltpu.PrefetchScalarGridSpec(
            num_scalar_prefetch=0,
            grid=(num_tiles,),
            in_specs=[
                pl.BlockSpec((tb, L), lambda i: (i, 0)),   # input batch tile
                pl.BlockSpec((L, L), lambda i: (0, 0)),    # GaussianVector (VMEM-resident)
                pl.BlockSpec((tb, 1), lambda i: (i, 0)),   # targets for this tile
            ],
            out_specs=out_spec,
        ),
        compiler_params=pltpu.CompilerParams(
            dimension_semantics=("parallel",),             # tiles independent (megacore)
        ),
    )(x, gaussian_vector, tgt2d)

    if mean:
        return jnp.sum(out) / jnp.float32(B)
    return out[0]


if __name__ == "__main__":
    NUM_LABELS = 128
    SIGMA = 2.0

    gaussian_np = make_gaussian_vector(NUM_LABELS, SIGMA)
    gaussian = jnp.asarray(gaussian_np)

    key = jax.random.PRNGKey(0)

    # Case 1: small batch, single tile.
    # Case 2: ragged batch (B % tb != 0), multiple tiles -> exercises masking.
    for batch in (8, 20):
        kx, kt, key = jax.random.split(key, 3)
        x = jax.random.normal(kx, (batch, NUM_LABELS), dtype=jnp.float32)
        target = jax.random.randint(kt, (batch,), 0, NUM_LABELS, dtype=jnp.int32)

        ref_per = jnp.sum((x - gaussian[target, :]) ** 2, axis=1)

        loss = heatmap1d_loss(x, gaussian, target, reduction="mean")
        loss = jax.block_until_ready(loss)
        np.testing.assert_allclose(
            np.asarray(loss), np.asarray(jnp.mean(ref_per)), rtol=1e-5, atol=1e-5)

        per = heatmap1d_loss(x, gaussian, target, reduction="none")
        per = jax.block_until_ready(per)
        np.testing.assert_allclose(
            np.asarray(per), np.asarray(ref_per), rtol=1e-5, atol=1e-5)

    print("KERNEL_OK")
</pallas_src>

<mosaic_0001>
module attributes {stable_mosaic.version = 11 : i64} {
  func.func @kernel(%arg0: i32, %arg1: memref<8x128xf32, #tpu.memory_space<vmem>>, %arg2: memref<128x128xf32, #tpu.memory_space<vmem>>, %arg3: memref<8x1xi32, #tpu.memory_space<vmem>>, %arg4: memref<1x128xf32, #tpu.memory_space<vmem>>) attributes {dimension_semantics = [#tpu.dimension_semantics<parallel>], iteration_bounds = array<i64: 1>, scalar_prefetch = 0 : i64, scratch_operands = 0 : i64, tpu.core_type = #tpu.core_type<tc>, window_params = [{transform_indices = @transform_0, window_bounds = array<i64: 8, 128>}, {pipeline_mode = #tpu.pipeline_mode<synchronous>, transform_indices = @transform_1, window_bounds = array<i64: 128, 128>}, {transform_indices = @transform_2, window_bounds = array<i64: 8, 1>}, {transform_indices = @transform_3, window_bounds = array<i64: 1, 128>}]} {
    %c0 = arith.constant 0 : index
    %c0_0 = arith.constant 0 : index
    %0 = vector.load %arg1[%c0, %c0_0] : memref<8x128xf32, #tpu.memory_space<vmem>>, vector<8x128xf32>
    %c0_1 = arith.constant 0 : index
    %c0_2 = arith.constant 0 : index
    %1 = vector.load %arg2[%c0_1, %c0_2] : memref<128x128xf32, #tpu.memory_space<vmem>>, vector<128x128xf32>
    %c0_3 = arith.constant 0 : index
    %c0_4 = arith.constant 0 : index
    %2 = vector.load %arg3[%c0_3, %c0_4] : memref<8x1xi32, #tpu.memory_space<vmem>>, vector<8x1xi32>
    %3 = tpu.iota {dimensions = array<i32: 1>} : vector<8x128xi32>
    %4 = vector.broadcast %2 : vector<8x1xi32> to vector<8x128xi32>
    %5 = arith.cmpi eq, %3, %4 : vector<8x128xi32>
    %6 = arith.extui %5 : vector<8x128xi1> to vector<8x128xi32>
    %7 = arith.sitofp %6 : vector<8x128xi32> to vector<8x128xf32>
    %cst = arith.constant dense<0.000000e+00> : vector<8x128xf32>
    %8 = tpu.matmul %7, %1, %cst {dimension_numbers = #tpu.dot_dimension_numbers<[1], [0], [0], [1], [0, 0, 1, 1], [], []>, precision = #tpu.contract_precision<fp32>} : vector<8x128xf32>, vector<128x128xf32>, vector<8x128xf32> -> vector<8x128xf32>
    %9 = arith.subf %0, %8 : vector<8x128xf32>
    %10 = arith.mulf %9, %9 : vector<8x128xf32>
    %cst_5 = arith.constant dense<0.000000e+00> : vector<128xf32>
    %11 = vector.multi_reduction <add>, %10, %cst_5 [0] : vector<8x128xf32> to vector<128xf32>
    %12 = vector.shape_cast %11 : vector<128xf32> to vector<1x128xf32>
    %c0_6 = arith.constant 0 : index
    %c0_7 = arith.constant 0 : index
    %13 = vector.load %arg4[%c0_6, %c0_7] : memref<1x128xf32, #tpu.memory_space<vmem>>, vector<1x128xf32>
    tpu.vector_store %arg4[%c0_6, %c0_7], %12 {strides = array<i32>} : memref<1x128xf32, #tpu.memory_space<vmem>>, vector<1x128xf32>,
    return
  }
  func.func @transform_0(%arg0: i32) -> (i32, i32) {
    %c0_i32 = arith.constant 0 : i32
    %c0_i32_0 = arith.constant 0 : i32
    return %arg0, %c0_i32 : i32, i32
  }
  func.func @transform_1(%arg0: i32) -> (i32, i32) {
    %c0_i32 = arith.constant 0 : i32
    %c0_i32_0 = arith.constant 0 : i32
    %c0_i32_1 = arith.constant 0 : i32
    return %c0_i32, %c0_i32_0 : i32, i32
  }
  func.func @transform_2(%arg0: i32) -> (i32, i32) {
    %c0_i32 = arith.constant 0 : i32
    %c0_i32_0 = arith.constant 0 : i32
    return %arg0, %c0_i32 : i32, i32
  }
  func.func @transform_3(%arg0: i32) -> (i32, i32) {
    %c0_i32 = arith.constant 0 : i32
    %c0_i32_0 = arith.constant 0 : i32
    return %arg0, %c0_i32 : i32, i32
  }
}

</mosaic_0001>

<bundles_post_ra>
// kernel: tpu_custom_call.1
= control target key start
LH: loop header
LB: loop body
LE: loop exit
PB: predicated region body
PF: predicated region fallthrough
CT: control target
= control target key end

     0   :  { %8 = vsyncpa [#allocation3], 0  ;;  %s755_s0 = inlined_call_operand.vmem [shape: f32[8,128], index: 0, kind: input, shape index: {}]   ;;  %s756_s1 = inlined_call_operand.hbm [shape: f32[128,128], index: 1, kind: input, shape index: {}]   ;;  %s757_s2 = inlined_call_operand.vmem [shape: s32[8,1], index: 2, kind: input, shape index: {}]   ;;  %s758_s3 = inlined_call_operand.hbm [shape: f32[1,128], index: 3, kind: output, shape index: {}]  }
   0x1   :  { %9 = vsyncpa [#allocation4], 0  ;;  %s16_s14 = sshll.u32 %s756_s1, 4  ;;  %s488_s15 = smov [#allocation2]   ;;  %s17_s14 = int_to_ptr.hbm [resolvable:$true] %s16_s14 }
   0x2   :  { %s18_s16 = sshll.u32 %s488_s15, 4  ;;  %s489_s17 = smov 128   ;;  %s19_s16 = int_to_ptr.vmem [resolvable:$true] %s18_s16 }
   0x3   :  { %s490_s18 = smov 8  }
   0x4   :  { %24 = dma.hbm_to_vmem [thread:$0]  %s17_s14, 2048, %s19_s16, [#allocation3], %s489_s17, %s489_s17, %s490_s18  }
   0x5   :  { %484 = dma.done.wait [#allocation3], 2048  }
   0x6   :  { %485 = vsyncadd [#allocation3], 4294965248  ;;  %v491_v0 = vmov 0   ;;  %v48_v1 = vld [vmem:[%s757_s2] sm:$0xff]  ;;  %v47_v2 = vld [vmem:[#allocation2 + $0x78] sm:$0xff]  ;;  %s494_s21 = smov [#allocation5]  }
   0x7   :  { %435 = vset.pattern.permute.xlu0 %v491_v0  ;;  %v46_v3 = vld [vmem:[#allocation2 + $0x70] sm:$0xff]  ;;  %v521_v4 = vand.u32 4294901760, %v47_v2  ;;  %v45_v6 = vld [vmem:[#allocation2 + $0x68] sm:$0xff]  ;;  %v44_v7 = vld [vmem:[#allocation2 + $0x60] sm:$0xff]  ;;  %s412_s22 = sshll.u32 %s494_s21, 4  ;;  %s414_s25 = sshll.u32 %s758_s3, 4  ;;  %s413_s22 = int_to_ptr.vmem [resolvable:$true] %s412_s22  ;;  %s415_s25 = int_to_ptr.hbm [resolvable:$true] %s414_s25 }
   0x8   :  { %52 = vperm.xlu0 %435, %v48_v1   ;;  %v523_v5 = vand.u32 4294901760, %v46_v3  ;;  %v43_v8 = vld [vmem:[#allocation2 + $0x58] sm:$0xff]  ;;  %v525_v9 = vand.u32 4294901760, %v45_v6  ;;  %v527_v10 = vand.u32 4294901760, %v44_v7  ;;  %v42_v12 = vld [vmem:[#allocation2 + $0x50] sm:$0xff]  ;;  %v41_v13 = vld [vmem:[#allocation2 + $0x48] sm:$0xff] }
   0x9   :  { %v529_v11 = vand.u32 4294901760, %v43_v8  ;;  %v40_v14 = vld [vmem:[#allocation2 + $0x40] sm:$0xff]  ;;  %v532_v15 = vsub.f32 %v47_v2, %v521_v4  ;;  %58 = vmatpush.msra.mxu0 %v521_v4  ;;  %v538_v17 = vand.u32 4294901760, %v42_v12  ;;  %v540_v18 = vand.u32 4294901760, %v41_v13  ;;  %254 = vmatpush.msra.mxu3 %v521_v4  ;;  %v39_v35 = vld [vmem:[#allocation2 + $0x38] sm:$0xff]  ;;  %v38_v36 = vld [vmem:[#allocation2 + $0x30] sm:$0xff] }
   0xa   :  { %v535_v16 = vsub.f32 %v46_v3, %v523_v5  ;;  %v544_v19 = vsub.f32 %v45_v6, %v525_v9  ;;  %v547_v20 = vsub.f32 %v44_v7, %v527_v10  ;;  %v552_v22 = vand.u32 4294901760, %v40_v14  ;;  %v37_v40 = vld [vmem:[#allocation2 + $0x28] sm:$0xff]  ;;  %v36_v42 = vld [vmem:[#allocation2 + $0x20] sm:$0xff]  ;;  %v35_v50 = vld [vmem:[#allocation2 + $0x18] sm:$0xff] }
   0xb   :  { %v550_v21 = vsub.f32 %v43_v8, %v529_v11  ;;  %v100_v23 = vand.u32 4294901760, %v532_v15  ;;  %v557_v25 = vsub.f32 %v42_v12, %v538_v17  ;;  %60 = vmatpush.msra.mxu0 %v523_v5  ;;  %201 = vmatpush.msra.mxu2 %v532_v15  ;;  %v564_v28 = vsub.f32 %v41_v13, %v540_v18  ;;  %v34_v56 = vld [vmem:[#allocation2 + $0x10] sm:$0xff]  ;;  %v33_v62 = vld [vmem:[#allocation2 + $0x8] sm:$0xff]  ;;  %v32_v6 = vld [vmem:[#allocation2] sm:$0xff] }
   0xc   :  { %v106_v24 = vand.u32 4294901760, %v535_v16  ;;  %v112_v26 = vand.u32 4294901760, %v544_v19  ;;  %v118_v27 = vand.u32 4294901760, %v547_v20  ;;  %256 = vmatpush.msra.mxu3 %v523_v5  ;;  %v581_v34 = vsub.f32 %v40_v14, %v552_v22 }
   0xd   :  { %v101_v29 = vsub.f32 %v532_v15, %v100_v23  ;;  %v124_v31 = vand.u32 4294901760, %v550_v21  ;;  %62 = vmatpush.msra.mxu0 %v525_v9  ;;  %204 = vmatpush.msra.mxu2 %v535_v16  ;;  %v130_v33 = vand.u32 4294901760, %v557_v25  ;;  %v136_v41 = vand.u32 4294901760, %v564_v28 }
   0xe   :  { %v107_v30 = vsub.f32 %v535_v16, %v106_v24  ;;  %v113_v32 = vsub.f32 %v544_v19, %v112_v26  ;;  %258 = vmatpush.msra.mxu3 %v525_v9  ;;  %v119_v39 = vsub.f32 %v547_v20, %v118_v27  ;;  %v594_v45 = vand.u32 4294901760, %v39_v35 }
   0xf   :  { %v102_v37 = vand.u32 4294901760, %v101_v29  ;;  %64 = vmatpush.msra.mxu0 %v527_v10  ;;  %207 = vmatpush.msra.mxu2 %v544_v19  ;;  %v125_v44 = vsub.f32 %v550_v21, %v124_v31  ;;  %v597_v46 = vand.u32 4294901760, %v38_v36  ;;  %v131_v47 = vsub.f32 %v557_v25, %v130_v33 }
  0x10   :  { %v108_v38 = vand.u32 4294901760, %v107_v30  ;;  %260 = vmatpush.msra.mxu3 %v527_v10  ;;  %v114_v43 = vand.u32 4294901760, %v113_v32  ;;  %v142_v48 = vand.u32 4294901760, %v581_v34  ;;  %v603_v49 = vand.u32 4294901760, %v37_v40 }
  0x11   :  { %103 = vmatpush.msra.mxu1 %v102_v37  ;;  %66 = vmatpush.msra.mxu0 %v529_v11  ;;  %v120_v51 = vand.u32 4294901760, %v119_v39  ;;  %v608_v52 = vsub.f32 %v39_v35, %v594_v45  ;;  %v611_v53 = vsub.f32 %v38_v36, %v597_v46  ;;  %v614_v54 = vand.u32 4294901760, %v36_v42 }
  0x12   :  { %210 = vmatpush.msra.mxu2 %v547_v20  ;;  %262 = vmatpush.msra.mxu3 %v529_v11  ;;  %v137_v55 = vsub.f32 %v564_v28, %v136_v41  ;;  %v126_v57 = vand.u32 4294901760, %v125_v44  ;;  %v623_v59 = vsub.f32 %v37_v40, %v603_v49  ;;  %v626_v60 = vand.u32 4294901760, %v35_v50 }
  0x13   :  { %109 = vmatpush.msra.mxu1 %v108_v38  ;;  %68 = vmatpush.msra.mxu0 %v538_v17  ;;  %v148_v58 = vand.u32 4294901760, %v608_v52  ;;  %v143_v61 = vsub.f32 %v581_v34, %v142_v48  ;;  %v132_v63 = vand.u32 4294901760, %v131_v47  ;;  %v154_v0 = vand.u32 4294901760, %v611_v53 }
  0x14   :  { %213 = vmatpush.msra.mxu2 %v550_v21  ;;  %264 = vmatpush.msra.mxu3 %v538_v17  ;;  %v635_v1 = vsub.f32 %v36_v42, %v614_v54  ;;  %v638_v2 = vand.u32 4294901760, %v34_v56  ;;  %v138_v3 = vand.u32 4294901760, %v137_v55  ;;  %v160_v8 = vand.u32 4294901760, %v623_v59 }
  0x15   :  { %115 = vmatpush.msra.mxu1 %v114_v43  ;;  %70 = vmatpush.msra.mxu0 %v540_v18  ;;  %v149_v7 = vsub.f32 %v608_v52, %v148_v58  ;;  %v647_v12 = vsub.f32 %v35_v50, %v626_v60  ;;  %v650_v13 = vand.u32 4294901760, %v33_v62  ;;  %v144_v14 = vand.u32 4294901760, %v143_v61 }
  0x16   :  { %216 = vmatpush.msra.mxu2 %v557_v25  ;;  %266 = vmatpush.msra.mxu3 %v540_v18  ;;  %v155_v29 = vsub.f32 %v611_v53, %v154_v0  ;;  %v166_v30 = vand.u32 4294901760, %v635_v1  ;;  %v659_v32 = vsub.f32 %v34_v56, %v638_v2  ;;  %v662_v35 = vand.u32 4294901760, %v32_v6 }
  0x17   :  { %121 = vmatpush.msra.mxu1 %v120_v51  ;;  %72 = vmatpush.msra.mxu0 %v552_v22  ;;  %v150_v36 = vand.u32 4294901760, %v149_v7  ;;  %v161_v37 = vsub.f32 %v623_v59, %v160_v8  ;;  %v172_v38 = vand.u32 4294901760, %v647_v12  ;;  %v671_v39 = vsub.f32 %v33_v62, %v650_v13 }
  0x18   :  { %219 = vmatpush.msra.mxu2 %v564_v28  ;;  %268 = vmatpush.msra.mxu3 %v552_v22  ;;  %v156_v40 = vand.u32 4294901760, %v155_v29  ;;  %v167_v42 = vsub.f32 %v635_v1, %v166_v30  ;;  %v178_v43 = vand.u32 4294901760, %v659_v32  ;;  %v681_v44 = vsub.f32 %v32_v6, %v662_v35 }
  0x19   :  { %127 = vmatpush.msra.mxu1 %v126_v57  ;;  %74 = vmatpush.msra.mxu0 %v594_v45  ;;  %v162_v47 = vand.u32 4294901760, %v161_v37  ;;  %v173_v50 = vsub.f32 %v647_v12, %v172_v38  ;;  %v184_v51 = vand.u32 4294901760, %v671_v39 }
  0x1a   :  { %222 = vmatpush.msra.mxu2 %v581_v34  ;;  %270 = vmatpush.msra.mxu3 %v594_v45  ;;  %v168_v55 = vand.u32 4294901760, %v167_v42  ;;  %v179_v56 = vsub.f32 %v659_v32, %v178_v43  ;;  %v190_v57 = vand.u32 4294901760, %v681_v44 }
  0x1b   :  { %133 = vmatpush.msra.mxu1 %v132_v63  ;;  %76 = vmatpush.msra.mxu0 %v597_v46  ;;  %v174_v61 = vand.u32 4294901760, %v173_v50  ;;  %v185_v62 = vsub.f32 %v671_v39, %v184_v51 }
  0x1c   :  { %225 = vmatpush.msra.mxu2 %v608_v52  ;;  %272 = vmatpush.msra.mxu3 %v597_v46  ;;  %v180_v63 = vand.u32 4294901760, %v179_v56 }
  0x1d   :  { %139 = vmatpush.msra.mxu1 %v138_v3  ;;  %78 = vmatpush.msra.mxu0 %v603_v49  ;;  %v191_v3 = vsub.f32 %v681_v44, %v190_v57  ;;  %v186_v6 = vand.u32 4294901760, %v185_v62 }
  0x1e   :  { %228 = vmatpush.msra.mxu2 %v611_v53  ;;  %274 = vmatpush.msra.mxu3 %v603_v49 }
  0x1f   :  { %145 = vmatpush.msra.mxu1 %v144_v14  ;;  %80 = vmatpush.msra.mxu0 %v614_v54  ;;  %v192_v7 = vand.u32 4294901760, %v191_v3 }
  0x20   :  { %231 = vmatpush.msra.mxu2 %v623_v59  ;;  %276 = vmatpush.msra.mxu3 %v614_v54 }
  0x21   :  { %151 = vmatpush.msra.mxu1 %v150_v36  ;;  %82 = vmatpush.msra.mxu0 %v626_v60 }
  0x22   :  { %234 = vmatpush.msra.mxu2 %v635_v1  ;;  %278 = vmatpush.msra.mxu3 %v626_v60 }
  0x23   :  { %157 = vmatpush.msra.mxu1 %v156_v40  ;;  %84 = vmatpush.msra.mxu0 %v638_v2 }
  0x24   :  { %237 = vmatpush.msra.mxu2 %v647_v12  ;;  %280 = vmatpush.msra.mxu3 %v638_v2 }
  0x25   :  { %163 = vmatpush.msra.mxu1 %v162_v47  ;;  %86 = vmatpush.msra.mxu0 %v650_v13 }
  0x26   :  { %240 = vmatpush.msra.mxu2 %v659_v32  ;;  %282 = vmatpush.msra.mxu3 %v650_v13 }
  0x27   :  { %169 = vmatpush.msra.mxu1 %v168_v55  ;;  %88 = vmatpush.msra.mxu0 %v662_v35 }
  0x28   :  { %243 = vmatpush.msra.mxu2 %v671_v39  ;;  %284 = vmatpush.msra.mxu3 %v662_v35 }
  0x29   :  { %295 = vmatpush.msrb.mxu0 %v100_v23  ;;  %175 = vmatpush.msra.mxu1 %v174_v61 }
  0x2a   :  { %246 = vmatpush.msra.mxu2 %v681_v44 }
  0x2b   :  { %299 = vmatpush.msrb.mxu0 %v106_v24  ;;  %181 = vmatpush.msra.mxu1 %v180_v63 }
  0x2d   :  { %303 = vmatpush.msrb.mxu0 %v112_v26  ;;  %187 = vmatpush.msra.mxu1 %v186_v6 }
  0x2f   :  { %307 = vmatpush.msrb.mxu0 %v118_v27  ;;  %193 = vmatpush.msra.mxu1 %v192_v7 }
  0x31   :  { %362 = vmatpush.msrb.mxu1 %v521_v4  ;;  %311 = vmatpush.msrb.mxu0 %v124_v31  ;;  %v49_v4 = vlaneseq }
  0x33   :  { %364 = vmatpush.msrb.mxu1 %v523_v5  ;;  %315 = vmatpush.msrb.mxu0 %v130_v33  ;;  %v50_v5 = vand.u32 127, %v49_v4  ;;  %v31_v33 = vld [vmem:[%s755_s0] sm:$0xff] }
  0x35   :  { %366 = vmatpush.msrb.mxu1 %v525_v9  ;;  %319 = vmatpush.msrb.mxu0 %v136_v41 }
  0x37   :  { %368 = vmatpush.msrb.mxu1 %v527_v10  ;;  %323 = vmatpush.msrb.mxu0 %v142_v48  ;;  %v492_v10 = vmov 1.0  }
  0x39   :  { %370 = vmatpush.msrb.mxu1 %v529_v11  ;;  %327 = vmatpush.msrb.mxu0 %v148_v58  ;;  %v493_v11 = vmov 0.0  }
  0x3b   :  { %372 = vmatpush.msrb.mxu1 %v538_v17  ;;  %331 = vmatpush.msrb.mxu0 %v154_v0 }
  0x3d   :  { %374 = vmatpush.msrb.mxu1 %v540_v18  ;;  %335 = vmatpush.msrb.mxu0 %v160_v8 }
  0x3f   :  { %376 = vmatpush.msrb.mxu1 %v552_v22  ;;  %339 = vmatpush.msrb.mxu0 %v166_v30 }
  0x41   :  { %378 = vmatpush.msrb.mxu1 %v594_v45  ;;  %343 = vmatpush.msrb.mxu0 %v172_v38 }
  0x43   :  { %380 = vmatpush.msrb.mxu1 %v597_v46  ;;  %347 = vmatpush.msrb.mxu0 %v178_v43 }
  0x45   :  { %382 = vmatpush.msrb.mxu1 %v603_v49  ;;  %351 = vmatpush.msrb.mxu0 %v184_v51 }
  0x47   :  { %384 = vmatpush.msrb.mxu1 %v614_v54  ;;  %355 = vmatpush.msrb.mxu0 %v190_v57 }
  0x49   :  { %386 = vmatpush.msrb.mxu1 %v626_v60 }
  0x4b   :  { %388 = vmatpush.msrb.mxu1 %v638_v2 }
  0x4d   :  { %390 = vmatpush.msrb.mxu1 %v650_v13 }
  0x4f   :  { %392 = vmatpush.msrb.mxu1 %v662_v35 }
  0x7a   :  { %v53_v9 = vpop.permute.xlu0 %52 }
  0x7b   :  { %vm54_vm0 = vcmp.eq.s32.totalorder %v50_v5, %v53_v9 }
  0x7c   :  { %425 = vmatmul.msk.f32.vlgmr.msra.gmra.mxu1 %vm54_vm0, %v492_v10  ;;  %v424_v15 = vsel %vm54_vm0, 1.0, %v493_v11 }
  0x7d   :  { %v90_v16 = vsub.f32 %v424_v15, %v424_v15 }
  0x7f   :  { %249 = vmatmul.f32.vlgmr.msra.gmra.mxu2 %v90_v16  ;;  %v91_v17 = vand.u32 4294901760, %v90_v16 }
  0x81   :  { %288 = vmatmul.f32.vlgmr.msra.gmra.mxu3 %v91_v17  ;;  %v92_v18 = vsub.f32 %v90_v16, %v91_v17 }
  0x83   :  { %v93_v19 = vand.u32 4294901760, %v92_v18 }
  0x84   :  { %427 = vmatmul.msk.f32.vlgmr.msrb.gmra.mxu1 %vm54_vm0, %v492_v10 }
  0x85   :  { %94 = vmatmul.f32.vlgmr.msra.gmra.mxu0 %v93_v19 }
  0x8d   :  { %426 = vmatmul.msk.f32.vlgmr.msrb.gmra.mxu0 %vm54_vm0, %v492_v10 }
  0xf9   :  { %v196_v20 = vpop.f32.mrf.mxu1 }
 0x101   :  { %v395_v31 = vpop.f32.mrf.mxu1 }
 0x102   :  { %v95_v21 = vpop.f32.mrf.mxu0  ;;  %v250_v23 = vpop.f32.mrf.mxu2 }
 0x103   :  { %v197_v22 = vadd.f32 %v196_v20, %v95_v21 }
 0x104   :  { %v289_v25 = vpop.f32.mrf.mxu3 }
 0x105   :  { %v251_v24 = vadd.f32 %v250_v23, %v197_v22 }
 0x107   :  { %v290_v26 = vadd.f32 %v289_v25, %v251_v24 }
 0x10a   :  { %v358_v27 = vpop.f32.mrf.mxu0 }
 0x10b   :  { %v359_v28 = vadd.f32 %v358_v27, %v290_v26 }
 0x10d   :  { %v396_v34 = vadd.f32 %v395_v31, %v359_v28 }
 0x10f   :  { %v398_v41 = vsub.f32 %v31_v33, %v396_v34 }
 0x111   :  { %v399_v45 = vmul.f32 %v398_v41, %v398_v41 }
 0x113   :  { %v400_v46 = vrot.slane %v399_v45, 4 }
 0x115   :  { %v401_v48 = vadd.f32 %v400_v46, %v399_v45 }
 0x117   :  { %v402_v49 = vrot.slane %v401_v48, 2 }
 0x119   :  { %v403_v52 = vadd.f32 %v402_v49, %v401_v48 }
 0x11b   :  { %v404_v53 = vrot.slane %v403_v52, 1 }
 0x11d   :  { %v405_v54 = vadd.f32 %v404_v53, %v403_v52 }
 0x11f   :  { %406 = vst [vmem:[#allocation5] sm:$0x1] %v405_v54 }
 0x120   :  { %417 = dma.vmem_to_hbm [thread:$0]  %s413_s22, 16, %s415_s25, [#allocation4]  }
 0x121   :  { %486 = dma.done.wait [#allocation4], 16  }
 0x122   :  { %487 = vsyncadd [#allocation4], 4294967280 }
 0x123   :  { %422 = vsyncpa [#allocation3], 1 }
 0x124   :  { %423 = vsyncpa [#allocation4], 1 }

</bundles_post_ra>
